<compile_context>
chip_gen: v7x
topology: tpu7x:2x2x1
jax: 0.10.0
libtpu: 0.0.40
codegen_flags: <defaults>
</compile_context>

<pallas_src>
import math
import functools

import jax
import jax.numpy as jnp
from jax import lax
from jax.experimental import pallas as pl
from jax.experimental.pallas import tpu as pltpu


def attention_kernel(x_ref, wq_ref, bq_ref, wk_ref, bk_ref, wv_ref, bv_ref,
                     wo_ref, bo_ref, out_ref, wts_ref, *,
                     head_dim, heads_per_block, q_tile):
    qi = pl.program_id(1)
    hg = pl.program_id(2)

    # x is bf16 already (cast once in the wrapper).
    xs = x_ref[0]                                             # (S, H) keys/values rows
    q_start = pl.multiple_of(qi * q_tile, q_tile)
    xq = x_ref[0, pl.ds(q_start, q_tile), :]                  # (tq, H) query rows

    # Grouped projections on the MXU: N = heads_per_block * head_dim.
    wq = wq_ref[hg]                                           # (H, HPB*hd) bf16, resident
    wk = wk_ref[hg]
    wv = wv_ref[hg]
    q = jnp.dot(xq, wq, preferred_element_type=jnp.float32) + bq_ref[hg]   # (tq, HPB*hd)
    k = jnp.dot(xs, wk, preferred_element_type=jnp.float32) + bk_ref[hg]   # (S,  HPB*hd)
    v = jnp.dot(xs, wv, preferred_element_type=jnp.float32) + bv_ref[hg]   # (S,  HPB*hd)

    # Fold 1/sqrt(head_dim) into q (tq*HPB*hd multiplies instead of tq*S per head).
    q = q * (1.0 / math.sqrt(head_dim))

    ctx_parts = []
    for p in range(heads_per_block):                          # static unrolled loop
        sl = slice(p * head_dim, (p + 1) * head_dim)
        qp = q[:, sl].astype(jnp.bfloat16)
        kp = k[:, sl].astype(jnp.bfloat16)
        vp = v[:, sl].astype(jnp.bfloat16)

        # scores = q @ k^T without materializing a transpose: contract the d axis.
        s = lax.dot_general(qp, kp,
                            dimension_numbers=(((1,), (1,)), ((), ())),
                            preferred_element_type=jnp.float32)            # (tq, S)

        # Numerically stable softmax in f32; exact divide (probs are returned).
        m = jnp.max(s, axis=-1, keepdims=True)
        e = jnp.exp(s - m)
        probs = e / jnp.sum(e, axis=-1, keepdims=True)

        wts_ref[0, p] = probs                                 # pre-dropout attention probs

        probs_bf = probs.astype(jnp.bfloat16)                 # cast once, reuse
        ctx_parts.append(jnp.dot(probs_bf, vp,
                                 preferred_element_type=jnp.float32))       # (tq, hd)

    ctx = ctx_parts[0] if heads_per_block == 1 else jnp.concatenate(ctx_parts, axis=-1)

    # Per-head-group contribution to the output projection: K = HPB*hd.
    contrib = jnp.dot(ctx.astype(jnp.bfloat16), wo_ref[hg],
                      preferred_element_type=jnp.float32)                   # (tq, H)

    @pl.when(hg == 0)
    def _():
        # Output block is resident across the head-group axis; seed it with the bias.
        out_ref[0] = jnp.broadcast_to(bo_ref[...], contrib.shape).astype(out_ref.dtype)

    out_ref[0] += contrib.astype(out_ref.dtype)


def _pick_heads_per_block(num_heads, head_dim, target=128):
    best = 1
    for g in range(1, num_heads + 1):
        if num_heads % g == 0 and g * head_dim <= target:
            best = g
    return best


def _pick_q_tile(seq_len, max_tq=256):
    if seq_len <= max_tq:
        return seq_len
    for t in range(max_tq, 7, -8):
        if seq_len % t == 0:
            return t
    return seq_len


def attention_forward(x, params, *, num_heads, heads_per_block=None, q_tile=None):
    B, S, H = x.shape
    head_dim = H // num_heads
    wq, bq, wk, bk, wv, bv, wo, bo = params

    if heads_per_block is None:
        heads_per_block = _pick_heads_per_block(num_heads, head_dim)
    assert num_heads % heads_per_block == 0
    n_groups = num_heads // heads_per_block
    ghd = heads_per_block * head_dim

    if q_tile is None:
        q_tile = _pick_q_tile(S)
    assert S % q_tile == 0
    n_q = S // q_tile

    bf16, f32 = jnp.bfloat16, jnp.float32

    # --- Wrapper-side layout plumbing (bf16 MXU operands, head-group-major stacks) ---
    def head_cols(w):    # (H, H) -> (G, H, HPB*hd): output columns of each head group
        return (w.reshape(H, num_heads, head_dim)
                 .transpose(1, 0, 2)                                  # (NH, H, hd)
                 .reshape(n_groups, heads_per_block, H, head_dim)
                 .transpose(0, 2, 1, 3)                               # (G, H, HPB, hd)
                 .reshape(n_groups, H, ghd)
                 .astype(bf16))

    def head_bias(b):    # (1, H) -> (G, 1, HPB*hd), kept in f32
        return b.reshape(n_groups, 1, ghd).astype(f32)

    def head_rows(w):    # (H, H) -> (G, HPB*hd, H): input rows of each head group (Wo)
        return w.reshape(n_groups, ghd, H).astype(bf16)

    wq_h, wk_h, wv_h = head_cols(wq), head_cols(wk), head_cols(wv)
    bq_h, bk_h, bv_h = head_bias(bq), head_bias(bk), head_bias(bv)
    wo_h = head_rows(wo)
    bo_f = bo.astype(f32)
    x_bf = x.astype(bf16)

    kernel = functools.partial(attention_kernel, head_dim=head_dim,
                               heads_per_block=heads_per_block, q_tile=q_tile)

    # x / output blocks follow (b, qi); weight stacks are grid-constant (resident).
    x_spec = pl.BlockSpec((1, S, H), lambda b, qi, hg: (b, 0, 0))
    wcol_spec = pl.BlockSpec((n_groups, H, ghd), lambda b, qi, hg: (0, 0, 0))
    bcol_spec = pl.BlockSpec((n_groups, 1, ghd), lambda b, qi, hg: (0, 0, 0))
    wrow_spec = pl.BlockSpec((n_groups, ghd, H), lambda b, qi, hg: (0, 0, 0))
    bo_spec = pl.BlockSpec((1, H), lambda b, qi, hg: (0, 0))

    out_shape = (
        jax.ShapeDtypeStruct((B, S, H), x.dtype),                   # attention_output
        jax.ShapeDtypeStruct((B, num_heads, S, S), jnp.float32),    # weights (probs)
    )

    flops = 8 * B * S * H * H + 4 * B * S * S * H
    bytes_accessed = (2 * B * S * H + 2 * 4 * H * H + 4 * 4 * H
                      + 4 * B * S * H + 4 * B * num_heads * S * S)
    cost = pl.CostEstimate(flops=flops,
                           transcendentals=B * num_heads * S * S,
                           bytes_accessed=bytes_accessed)

    return pl.pallas_call(
        kernel,
        out_shape=out_shape,
        grid_spec=pltpu.PrefetchScalarGridSpec(
            num_scalar_prefetch=0,
            grid=(B, n_q, n_groups),              # head-group axis last: reduction for `out`
            in_specs=[
                x_spec,                            # hidden_states (resident across qi, hg)
                wcol_spec, bcol_spec,              # query head-group stack + bias
                wcol_spec, bcol_spec,              # key
                wcol_spec, bcol_spec,              # value
                wrow_spec, bo_spec,                # out-projection stack + bias
            ],
            out_specs=[
                pl.BlockSpec((1, q_tile, H), lambda b, qi, hg: (b, qi, 0)),           # accumulated over hg
                pl.BlockSpec((1, heads_per_block, q_tile, S),
                             lambda b, qi, hg: (b, hg, qi, 0)),                        # per-group probs
            ],
        ),
        compiler_params=pltpu.CompilerParams(
            # b and q-tile axes parallel (fills both v7x TensorCores even at B==1);
            # head-group axis is the output reduction -> arbitrary.
            dimension_semantics=("parallel", "parallel", "arbitrary"),
            # Above the 16 MiB (v5e) / 32 MiB (v6e, v7x) scoped defaults, within
            # v7x's 64 MiB physical VMEM.
            vmem_limit_bytes=48 * 1024 * 1024,
        ),
        cost_estimate=cost,
    )(x_bf, wq_h, bq_h, wk_h, bk_h, wv_h, bv_h, wo_h, bo_f)


def reference_forward(x, params, *, num_heads):
    """Pure-JAX f32 reference mirroring the PyTorch module (eval mode)."""
    B, S, H = x.shape
    hd = H // num_heads
    wq, bq, wk, bk, wv, bv, wo, bo = params

    def split_heads(t):  # (B,S,H) -> (B,NH,S,hd)
        return t.reshape(B, S, num_heads, hd).transpose(0, 2, 1, 3)

    q = split_heads(x @ wq + bq[0])
    k = split_heads(x @ wk + bk[0])
    v = split_heads(x @ wv + bv[0])

    scores = jnp.einsum("bhqd,bhkd->bhqk", q, k) / math.sqrt(hd)
    probs = jax.nn.softmax(scores, axis=-1)
    ctx = jnp.einsum("bhqk,bhkd->bhqd", probs, v)
    ctx = ctx.transpose(0, 2, 1, 3).reshape(B, S, H)
    out = ctx @ wo + bo[0]
    return out, probs


if __name__ == "__main__":
    # Small shapes consistent with the module: hidden_size=32, num_heads=4, seq=8, batch=2.
    B, S, H = 2, 8, 32
    NUM_HEADS = 4

    key = jax.random.PRNGKey(0)
    kx, kq, kkq, kv, ko, kbq, kbk, kbv, kbo = jax.random.split(key, 9)

    x = jax.random.normal(kx, (B, S, H), dtype=jnp.float32)

    # Weights stored as (in, out) so the kernel does x @ W + b (equivalent to
    # PyTorch Linear's x @ W.T + b with W of shape (out, in)).
    def init_w(k):
        return jax.random.normal(k, (H, H), dtype=jnp.float32) * 0.05

    def init_b(k):
        return jax.random.normal(k, (1, H), dtype=jnp.float32) * 0.01

    params = (init_w(kq), init_b(kbq),
              init_w(kkq), init_b(kbk),
              init_w(kv), init_b(kbv),
              init_w(ko), init_b(kbo))

    out, weights = attention_forward(x, params, num_heads=NUM_HEADS)
    jax.block_until_ready((out, weights))

    out_ref, weights_ref = reference_forward(x, params, num_heads=NUM_HEADS)
    assert out.shape == (B, S, H)
    assert weights.shape == (B, NUM_HEADS, S, S)
    # bf16 MXU operands with f32 accumulation => relaxed tolerance vs pure-f32 ref.
    assert jnp.allclose(out, out_ref, atol=2e-2, rtol=2e-2), \
        float(jnp.max(jnp.abs(out - out_ref)))
    assert jnp.allclose(weights, weights_ref, atol=1e-2, rtol=1e-2), \
        float(jnp.max(jnp.abs(weights - weights_ref)))

    print("KERNEL_OK")
</pallas_src>

<mosaic_0001>
module attributes {stable_mosaic.version = 11 : i64} {
  func.func @attention_kernel(%arg0: i32, %arg1: i32, %arg2: i32, %arg3: memref<1x8x32xbf16, #tpu.memory_space<vmem>>, %arg4: memref<1x32x32xbf16, #tpu.memory_space<vmem>>, %arg5: memref<1x1x32xf32, #tpu.memory_space<vmem>>, %arg6: memref<1x32x32xbf16, #tpu.memory_space<vmem>>, %arg7: memref<1x1x32xf32, #tpu.memory_space<vmem>>, %arg8: memref<1x32x32xbf16, #tpu.memory_space<vmem>>, %arg9: memref<1x1x32xf32, #tpu.memory_space<vmem>>, %arg10: memref<1x32x32xbf16, #tpu.memory_space<vmem>>, %arg11: memref<1x32xf32, #tpu.memory_space<vmem>>, %arg12: memref<1x8x32xf32, #tpu.memory_space<vmem>>, %arg13: memref<1x4x8x8xf32, #tpu.memory_space<vmem>>) attributes {dimension_semantics = [#tpu.dimension_semantics<parallel>, #tpu.dimension_semantics<parallel>, #tpu.dimension_semantics<arbitrary>], iteration_bounds = array<i64: 2, 1, 1>, scalar_prefetch = 0 : i64, scratch_operands = 0 : i64, tpu.core_type = #tpu.core_type<tc>, window_params = [{transform_indices = @transform_0, window_bounds = array<i64: 1, 8, 32>}, {pipeline_mode = #tpu.pipeline_mode<synchronous>, transform_indices = @transform_1, window_bounds = array<i64: 1, 32, 32>}, {pipeline_mode = #tpu.pipeline_mode<synchronous>, transform_indices = @transform_2, window_bounds = array<i64: 1, 1, 32>}, {pipeline_mode = #tpu.pipeline_mode<synchronous>, transform_indices = @transform_3, window_bounds = array<i64: 1, 32, 32>}, {pipeline_mode = #tpu.pipeline_mode<synchronous>, transform_indices = @transform_4, window_bounds = array<i64: 1, 1, 32>}, {pipeline_mode = #tpu.pipeline_mode<synchronous>, transform_indices = @transform_5, window_bounds = array<i64: 1, 32, 32>}, {pipeline_mode = #tpu.pipeline_mode<synchronous>, transform_indices = @transform_6, window_bounds = array<i64: 1, 1, 32>}, {pipeline_mode = #tpu.pipeline_mode<synchronous>, transform_indices = @transform_7, window_bounds = array<i64: 1, 32, 32>}, {pipeline_mode = #tpu.pipeline_mode<synchronous>, transform_indices = @transform_8, window_bounds = array<i64: 1, 32>}, {transform_indices = @transform_9, window_bounds = array<i64: 1, 8, 32>}, {transform_indices = @transform_10, window_bounds = array<i64: 1, 4, 8, 8>}]} {
    %c0 = arith.constant 0 : index
    %c0_0 = arith.constant 0 : index
    %c0_1 = arith.constant 0 : index
    %0 = vector.load %arg3[%c0, %c0_0, %c0_1] : memref<1x8x32xbf16, #tpu.memory_space<vmem>>, vector<1x8x32xbf16>
    %1 = vector.shape_cast %0 : vector<1x8x32xbf16> to vector<8x32xbf16>
    %c8_i32 = arith.constant 8 : i32
    %2 = arith.muli %arg1, %c8_i32 : i32
    %3 = tpu.assume_multiple %2, 8 : i32
    %c0_2 = arith.constant 0 : index
    %4 = arith.index_cast %3 : i32 to index
    %c0_3 = arith.constant 0 : index
    %5 = vector.load %arg3[%c0_2, %4, %c0_3] : memref<1x8x32xbf16, #tpu.memory_space<vmem>>, vector<1x8x32xbf16>
    %6 = vector.shape_cast %5 : vector<1x8x32xbf16> to vector<8x32xbf16>
    %7 = arith.index_cast %arg2 : i32 to index
    %c0_4 = arith.constant 0 : index
    %c0_5 = arith.constant 0 : index
    %8 = vector.load %arg4[%7, %c0_4, %c0_5] : memref<1x32x32xbf16, #tpu.memory_space<vmem>>, vector<1x32x32xbf16>
    %9 = vector.shape_cast %8 : vector<1x32x32xbf16> to vector<32x32xbf16>
    %10 = arith.index_cast %arg2 : i32 to index
    %c0_6 = arith.constant 0 : index
    %c0_7 = arith.constant 0 : index
    %11 = vector.load %arg6[%10, %c0_6, %c0_7] : memref<1x32x32xbf16, #tpu.memory_space<vmem>>, vector<1x32x32xbf16>
    %12 = vector.shape_cast %11 : vector<1x32x32xbf16> to vector<32x32xbf16>
    %13 = arith.index_cast %arg2 : i32 to index
    %c0_8 = arith.constant 0 : index
    %c0_9 = arith.constant 0 : index
    %14 = vector.load %arg8[%13, %c0_8, %c0_9] : memref<1x32x32xbf16, #tpu.memory_space<vmem>>, vector<1x32x32xbf16>
    %15 = vector.shape_cast %14 : vector<1x32x32xbf16> to vector<32x32xbf16>
    %cst = arith.constant dense<0.000000e+00> : vector<8x32xf32>
    %16 = tpu.matmul %6, %9, %cst {dimension_numbers = #tpu.dot_dimension_numbers<[1], [0], [0], [1], [0, 0, 1, 1], [], []>} : vector<8x32xbf16>, vector<32x32xbf16>, vector<8x32xf32> -> vector<8x32xf32>
    %17 = arith.index_cast %arg2 : i32 to index
    %c0_10 = arith.constant 0 : index
    %c0_11 = arith.constant 0 : index
    %18 = vector.load %arg5[%17, %c0_10, %c0_11] : memref<1x1x32xf32, #tpu.memory_space<vmem>>, vector<1x1x32xf32>
    %19 = vector.shape_cast %18 : vector<1x1x32xf32> to vector<1x32xf32>
    %20 = vector.broadcast %19 : vector<1x32xf32> to vector<8x32xf32>
    %21 = arith.addf %16, %20 : vector<8x32xf32>
    %cst_12 = arith.constant dense<0.000000e+00> : vector<8x32xf32>
    %22 = tpu.matmul %1, %12, %cst_12 {dimension_numbers = #tpu.dot_dimension_numbers<[1], [0], [0], [1], [0, 0, 1, 1], [], []>} : vector<8x32xbf16>, vector<32x32xbf16>, vector<8x32xf32> -> vector<8x32xf32>
    %23 = arith.index_cast %arg2 : i32 to index
    %c0_13 = arith.constant 0 : index
    %c0_14 = arith.constant 0 : index
    %24 = vector.load %arg7[%23, %c0_13, %c0_14] : memref<1x1x32xf32, #tpu.memory_space<vmem>>, vector<1x1x32xf32>
    %25 = vector.shape_cast %24 : vector<1x1x32xf32> to vector<1x32xf32>
    %26 = vector.broadcast %25 : vector<1x32xf32> to vector<8x32xf32>
    %27 = arith.addf %22, %26 : vector<8x32xf32>
    %cst_15 = arith.constant dense<0.000000e+00> : vector<8x32xf32>
    %28 = tpu.matmul %1, %15, %cst_15 {dimension_numbers = #tpu.dot_dimension_numbers<[1], [0], [0], [1], [0, 0, 1, 1], [], []>} : vector<8x32xbf16>, vector<32x32xbf16>, vector<8x32xf32> -> vector<8x32xf32>
    %29 = arith.index_cast %arg2 : i32 to index
    %c0_16 = arith.constant 0 : index
    %c0_17 = arith.constant 0 : index
    %30 = vector.load %arg9[%29, %c0_16, %c0_17] : memref<1x1x32xf32, #tpu.memory_space<vmem>>, vector<1x1x32xf32>
    %31 = vector.shape_cast %30 : vector<1x1x32xf32> to vector<1x32xf32>
    %32 = vector.broadcast %31 : vector<1x32xf32> to vector<8x32xf32>
    %33 = arith.addf %28, %32 : vector<8x32xf32>
    %cst_18 = arith.constant 0.353553385 : f32
    %34 = vector.broadcast %cst_18 : f32 to vector<8x32xf32>
    %35 = arith.mulf %21, %34 : vector<8x32xf32>
    %36 = vector.extract_strided_slice %35 {offsets = [0, 0], sizes = [8, 8], strides = [1, 1]} : vector<8x32xf32> to vector<8x8xf32>
    %37 = arith.truncf %36 : vector<8x8xf32> to vector<8x8xbf16>
    %38 = vector.extract_strided_slice %27 {offsets = [0, 0], sizes = [8, 8], strides = [1, 1]} : vector<8x32xf32> to vector<8x8xf32>
    %39 = arith.truncf %38 : vector<8x8xf32> to vector<8x8xbf16>
    %40 = vector.extract_strided_slice %33 {offsets = [0, 0], sizes = [8, 8], strides = [1, 1]} : vector<8x32xf32> to vector<8x8xf32>
    %41 = arith.truncf %40 : vector<8x8xf32> to vector<8x8xbf16>
    %cst_19 = arith.constant dense<0.000000e+00> : vector<8x8xf32>
    %42 = tpu.matmul %37, %39, %cst_19 {dimension_numbers = #tpu.dot_dimension_numbers<[1], [1], [0], [0], [0, 0, 1, 0], [], []>} : vector<8x8xbf16>, vector<8x8xbf16>, vector<8x8xf32> -> vector<8x8xf32>
    %cst_20 = arith.constant dense<0xFF800000> : vector<8xf32>
    %43 = vector.multi_reduction <maximumf>, %42, %cst_20 [1] : vector<8x8xf32> to vector<8xf32>
    %44 = vector.shape_cast %43 : vector<8xf32> to vector<8x1xf32>
    %45 = vector.broadcast %44 : vector<8x1xf32> to vector<8x8xf32>
    %46 = arith.subf %42, %45 : vector<8x8xf32>
    %47 = math.exp %46 : vector<8x8xf32>
    %cst_21 = arith.constant dense<0.000000e+00> : vector<8xf32>
    %48 = vector.multi_reduction <add>, %47, %cst_21 [1] : vector<8x8xf32> to vector<8xf32>
    %49 = vector.shape_cast %48 : vector<8xf32> to vector<8x1xf32>
    %50 = vector.broadcast %49 : vector<8x1xf32> to vector<8x8xf32>
    %51 = arith.divf %47, %50 : vector<8x8xf32>
    %c0_22 = arith.constant 0 : index
    %c0_23 = arith.constant 0 : index
    %c0_24 = arith.constant 0 : index
    %c0_25 = arith.constant 0 : index
    %52 = vector.load %arg13[%c0_22, %c0_23, %c0_24, %c0_25] : memref<1x4x8x8xf32, #tpu.memory_space<vmem>>, vector<1x1x8x8xf32>
    %53 = vector.shape_cast %52 : vector<1x1x8x8xf32> to vector<8x8xf32>
    %54 = vector.shape_cast %51 : vector<8x8xf32> to vector<1x1x8x8xf32>
    tpu.vector_store %arg13[%c0_22, %c0_23, %c0_24, %c0_25], %54 {strides = array<i32>} : memref<1x4x8x8xf32, #tpu.memory_space<vmem>>, vector<1x1x8x8xf32>,
    %55 = arith.truncf %51 : vector<8x8xf32> to vector<8x8xbf16>
    %cst_26 = arith.constant dense<0.000000e+00> : vector<8x8xf32>
    %56 = tpu.matmul %55, %41, %cst_26 {dimension_numbers = #tpu.dot_dimension_numbers<[1], [0], [0], [1], [0, 0, 1, 1], [], []>} : vector<8x8xbf16>, vector<8x8xbf16>, vector<8x8xf32> -> vector<8x8xf32>
    %57 = vector.extract_strided_slice %35 {offsets = [0, 8], sizes = [8, 8], strides = [1, 1]} : vector<8x32xf32> to vector<8x8xf32>
    %58 = arith.truncf %57 : vector<8x8xf32> to vector<8x8xbf16>
    %59 = vector.extract_strided_slice %27 {offsets = [0, 8], sizes = [8, 8], strides = [1, 1]} : vector<8x32xf32> to vector<8x8xf32>
    %60 = arith.truncf %59 : vector<8x8xf32> to vector<8x8xbf16>
    %61 = vector.extract_strided_slice %33 {offsets = [0, 8], sizes = [8, 8], strides = [1, 1]} : vector<8x32xf32> to vector<8x8xf32>
    %62 = arith.truncf %61 : vector<8x8xf32> to vector<8x8xbf16>
    %cst_27 = arith.constant dense<0.000000e+00> : vector<8x8xf32>
    %63 = tpu.matmul %58, %60, %cst_27 {dimension_numbers = #tpu.dot_dimension_numbers<[1], [1], [0], [0], [0, 0, 1, 0], [], []>} : vector<8x8xbf16>, vector<8x8xbf16>, vector<8x8xf32> -> vector<8x8xf32>
    %cst_28 = arith.constant dense<0xFF800000> : vector<8xf32>
    %64 = vector.multi_reduction <maximumf>, %63, %cst_28 [1] : vector<8x8xf32> to vector<8xf32>
    %65 = vector.shape_cast %64 : vector<8xf32> to vector<8x1xf32>
    %66 = vector.broadcast %65 : vector<8x1xf32> to vector<8x8xf32>
    %67 = arith.subf %63, %66 : vector<8x8xf32>
    %68 = math.exp %67 : vector<8x8xf32>
    %cst_29 = arith.constant dense<0.000000e+00> : vector<8xf32>
    %69 = vector.multi_reduction <add>, %68, %cst_29 [1] : vector<8x8xf32> to vector<8xf32>
    %70 = vector.shape_cast %69 : vector<8xf32> to vector<8x1xf32>
    %71 = vector.broadcast %70 : vector<8x1xf32> to vector<8x8xf32>
    %72 = arith.divf %68, %71 : vector<8x8xf32>
    %c0_30 = arith.constant 0 : index
    %c1 = arith.constant 1 : index
    %c0_31 = arith.constant 0 : index
    %c0_32 = arith.constant 0 : index
    %73 = vector.load %arg13[%c0_30, %c1, %c0_31, %c0_32] : memref<1x4x8x8xf32, #tpu.memory_space<vmem>>, vector<1x1x8x8xf32>
    %74 = vector.shape_cast %73 : vector<1x1x8x8xf32> to vector<8x8xf32>
    %75 = vector.shape_cast %72 : vector<8x8xf32> to vector<1x1x8x8xf32>
    tpu.vector_store %arg13[%c0_30, %c1, %c0_31, %c0_32], %75 {strides = array<i32>} : memref<1x4x8x8xf32, #tpu.memory_space<vmem>>, vector<1x1x8x8xf32>,
    %76 = arith.truncf %72 : vector<8x8xf32> to vector<8x8xbf16>
    %cst_33 = arith.constant dense<0.000000e+00> : vector<8x8xf32>
    %77 = tpu.matmul %76, %62, %cst_33 {dimension_numbers = #tpu.dot_dimension_numbers<[1], [0], [0], [1], [0, 0, 1, 1], [], []>} : vector<8x8xbf16>, vector<8x8xbf16>, vector<8x8xf32> -> vector<8x8xf32>
    %78 = vector.extract_strided_slice %35 {offsets = [0, 16], sizes = [8, 8], strides = [1, 1]} : vector<8x32xf32> to vector<8x8xf32>
    %79 = arith.truncf %78 : vector<8x8xf32> to vector<8x8xbf16>
    %80 = vector.extract_strided_slice %27 {offsets = [0, 16], sizes = [8, 8], strides = [1, 1]} : vector<8x32xf32> to vector<8x8xf32>
    %81 = arith.truncf %80 : vector<8x8xf32> to vector<8x8xbf16>
    %82 = vector.extract_strided_slice %33 {offsets = [0, 16], sizes = [8, 8], strides = [1, 1]} : vector<8x32xf32> to vector<8x8xf32>
    %83 = arith.truncf %82 : vector<8x8xf32> to vector<8x8xbf16>
    %cst_34 = arith.constant dense<0.000000e+00> : vector<8x8xf32>
    %84 = tpu.matmul %79, %81, %cst_34 {dimension_numbers = #tpu.dot_dimension_numbers<[1], [1], [0], [0], [0, 0, 1, 0], [], []>} : vector<8x8xbf16>, vector<8x8xbf16>, vector<8x8xf32> -> vector<8x8xf32>
    %cst_35 = arith.constant dense<0xFF800000> : vector<8xf32>
    %85 = vector.multi_reduction <maximumf>, %84, %cst_35 [1] : vector<8x8xf32> to vector<8xf32>
    %86 = vector.shape_cast %85 : vector<8xf32> to vector<8x1xf32>
    %87 = vector.broadcast %86 : vector<8x1xf32> to vector<8x8xf32>
    %88 = arith.subf %84, %87 : vector<8x8xf32>
    %89 = math.exp %88 : vector<8x8xf32>
    %cst_36 = arith.constant dense<0.000000e+00> : vector<8xf32>
    %90 = vector.multi_reduction <add>, %89, %cst_36 [1] : vector<8x8xf32> to vector<8xf32>
    %91 = vector.shape_cast %90 : vector<8xf32> to vector<8x1xf32>
    %92 = vector.broadcast %91 : vector<8x1xf32> to vector<8x8xf32>
    %93 = arith.divf %89, %92 : vector<8x8xf32>
    %c0_37 = arith.constant 0 : index
    %c2 = arith.constant 2 : index
    %c0_38 = arith.constant 0 : index
    %c0_39 = arith.constant 0 : index
    %94 = vector.load %arg13[%c0_37, %c2, %c0_38, %c0_39] : memref<1x4x8x8xf32, #tpu.memory_space<vmem>>, vector<1x1x8x8xf32>
    %95 = vector.shape_cast %94 : vector<1x1x8x8xf32> to vector<8x8xf32>
    %96 = vector.shape_cast %93 : vector<8x8xf32> to vector<1x1x8x8xf32>
    tpu.vector_store %arg13[%c0_37, %c2, %c0_38, %c0_39], %96 {strides = array<i32>} : memref<1x4x8x8xf32, #tpu.memory_space<vmem>>, vector<1x1x8x8xf32>,
    %97 = arith.truncf %93 : vector<8x8xf32> to vector<8x8xbf16>
    %cst_40 = arith.constant dense<0.000000e+00> : vector<8x8xf32>
    %98 = tpu.matmul %97, %83, %cst_40 {dimension_numbers = #tpu.dot_dimension_numbers<[1], [0], [0], [1], [0, 0, 1, 1], [], []>} : vector<8x8xbf16>, vector<8x8xbf16>, vector<8x8xf32> -> vector<8x8xf32>
    %99 = vector.extract_strided_slice %35 {offsets = [0, 24], sizes = [8, 8], strides = [1, 1]} : vector<8x32xf32> to vector<8x8xf32>
    %100 = arith.truncf %99 : vector<8x8xf32> to vector<8x8xbf16>
    %101 = vector.extract_strided_slice %27 {offsets = [0, 24], sizes = [8, 8], strides = [1, 1]} : vector<8x32xf32> to vector<8x8xf32>
    %102 = arith.truncf %101 : vector<8x8xf32> to vector<8x8xbf16>
    %103 = vector.extract_strided_slice %33 {offsets = [0, 24], sizes = [8, 8], strides = [1, 1]} : vector<8x32xf32> to vector<8x8xf32>
    %104 = arith.truncf %103 : vector<8x8xf32> to vector<8x8xbf16>
    %cst_41 = arith.constant dense<0.000000e+00> : vector<8x8xf32>
    %105 = tpu.matmul %100, %102, %cst_41 {dimension_numbers = #tpu.dot_dimension_numbers<[1], [1], [0], [0], [0, 0, 1, 0], [], []>} : vector<8x8xbf16>, vector<8x8xbf16>, vector<8x8xf32> -> vector<8x8xf32>
    %cst_42 = arith.constant dense<0xFF800000> : vector<8xf32>
    %106 = vector.multi_reduction <maximumf>, %105, %cst_42 [1] : vector<8x8xf32> to vector<8xf32>
    %107 = vector.shape_cast %106 : vector<8xf32> to vector<8x1xf32>
    %108 = vector.broadcast %107 : vector<8x1xf32> to vector<8x8xf32>
    %109 = arith.subf %105, %108 : vector<8x8xf32>
    %110 = math.exp %109 : vector<8x8xf32>
    %cst_43 = arith.constant dense<0.000000e+00> : vector<8xf32>
    %111 = vector.multi_reduction <add>, %110, %cst_43 [1] : vector<8x8xf32> to vector<8xf32>
    %112 = vector.shape_cast %111 : vector<8xf32> to vector<8x1xf32>
    %113 = vector.broadcast %112 : vector<8x1xf32> to vector<8x8xf32>
    %114 = arith.divf %110, %113 : vector<8x8xf32>
    %c0_44 = arith.constant 0 : index
    %c3 = arith.constant 3 : index
    %c0_45 = arith.constant 0 : index
    %c0_46 = arith.constant 0 : index
    %115 = vector.load %arg13[%c0_44, %c3, %c0_45, %c0_46] : memref<1x4x8x8xf32, #tpu.memory_space<vmem>>, vector<1x1x8x8xf32>
    %116 = vector.shape_cast %115 : vector<1x1x8x8xf32> to vector<8x8xf32>
    %117 = vector.shape_cast %114 : vector<8x8xf32> to vector<1x1x8x8xf32>
    tpu.vector_store %arg13[%c0_44, %c3, %c0_45, %c0_46], %117 {strides = array<i32>} : memref<1x4x8x8xf32, #tpu.memory_space<vmem>>, vector<1x1x8x8xf32>,
    %118 = arith.truncf %114 : vector<8x8xf32> to vector<8x8xbf16>
    %cst_47 = arith.constant dense<0.000000e+00> : vector<8x8xf32>
    %119 = tpu.matmul %118, %104, %cst_47 {dimension_numbers = #tpu.dot_dimension_numbers<[1], [0], [0], [1], [0, 0, 1, 1], [], []>} : vector<8x8xbf16>, vector<8x8xbf16>, vector<8x8xf32> -> vector<8x8xf32>
    %120 = tpu.concatenate %56, %77, %98, %119 in 1 : vector<8x8xf32>, vector<8x8xf32>, vector<8x8xf32>, vector<8x8xf32> -> vector<8x32xf32>
    %121 = arith.truncf %120 : vector<8x32xf32> to vector<8x32xbf16>
    %122 = arith.index_cast %arg2 : i32 to index
    %c0_48 = arith.constant 0 : index
    %c0_49 = arith.constant 0 : index
    %123 = vector.load %arg10[%122, %c0_48, %c0_49] : memref<1x32x32xbf16, #tpu.memory_space<vmem>>, vector<1x32x32xbf16>
    %124 = vector.shape_cast %123 : vector<1x32x32xbf16> to vector<32x32xbf16>
    %cst_50 = arith.constant dense<0.000000e+00> : vector<8x32xf32>
    %125 = tpu.matmul %121, %124, %cst_50 {dimension_numbers = #tpu.dot_dimension_numbers<[1], [0], [0], [1], [0, 0, 1, 1], [], []>} : vector<8x32xbf16>, vector<32x32xbf16>, vector<8x32xf32> -> vector<8x32xf32>
    %c0_i32 = arith.constant 0 : i32
    %126 = arith.cmpi eq, %arg2, %c0_i32 : i32
    %127 = arith.extui %126 : i1 to i32
    %c0_i32_51 = arith.constant 0 : i32
    %128 = arith.cmpi ne, %127, %c0_i32_51 : i32
    scf.if %128 {
      %c0_58 = arith.constant 0 : index
      %c0_59 = arith.constant 0 : index
      %135 = vector.load %arg11[%c0_58, %c0_59] : memref<1x32xf32, #tpu.memory_space<vmem>>, vector<1x32xf32>
      %136 = vector.shape_cast %135 : vector<1x32xf32> to vector<1x32xf32>
      %137 = vector.broadcast %136 : vector<1x32xf32> to vector<8x32xf32>
      %c0_60 = arith.constant 0 : index
      %c0_61 = arith.constant 0 : index
      %c0_62 = arith.constant 0 : index
      %138 = vector.load %arg12[%c0_60, %c0_61, %c0_62] : memref<1x8x32xf32, #tpu.memory_space<vmem>>, vector<1x8x32xf32>
      %139 = vector.shape_cast %138 : vector<1x8x32xf32> to vector<8x32xf32>
      %140 = vector.shape_cast %137 : vector<8x32xf32> to vector<1x8x32xf32>
      tpu.vector_store %arg12[%c0_60, %c0_61, %c0_62], %140 {strides = array<i32>} : memref<1x8x32xf32, #tpu.memory_space<vmem>>, vector<1x8x32xf32>,
    } else {
    }
    %c0_52 = arith.constant 0 : index
    %c0_53 = arith.constant 0 : index
    %c0_54 = arith.constant 0 : index
    %129 = vector.load %arg12[%c0_52, %c0_53, %c0_54] : memref<1x8x32xf32, #tpu.memory_space<vmem>>, vector<1x8x32xf32>
    %130 = vector.shape_cast %129 : vector<1x8x32xf32> to vector<8x32xf32>
    %131 = arith.addf %130, %125 : vector<8x32xf32>
    %c0_55 = arith.constant 0 : index
    %c0_56 = arith.constant 0 : index
    %c0_57 = arith.constant 0 : index
    %132 = vector.load %arg12[%c0_55, %c0_56, %c0_57] : memref<1x8x32xf32, #tpu.memory_space<vmem>>, vector<1x8x32xf32>
    %133 = vector.shape_cast %132 : vector<1x8x32xf32> to vector<8x32xf32>
    %134 = vector.shape_cast %131 : vector<8x32xf32> to vector<1x8x32xf32>
    tpu.vector_store %arg12[%c0_55, %c0_56, %c0_57], %134 {strides = array<i32>} : memref<1x8x32xf32, #tpu.memory_space<vmem>>, vector<1x8x32xf32>,
    return
  }
  func.func @transform_0(%arg0: i32, %arg1: i32, %arg2: i32) -> (i32, i32, i32) {
    %c0_i32 = arith.constant 0 : i32
    %c0_i32_0 = arith.constant 0 : i32
    %c0_i32_1 = arith.constant 0 : i32
    return %arg0, %c0_i32, %c0_i32_0 : i32, i32, i32
  }
  func.func @transform_1(%arg0: i32, %arg1: i32, %arg2: i32) -> (i32, i32, i32) {
    %c0_i32 = arith.constant 0 : i32
    %c0_i32_0 = arith.constant 0 : i32
    %c0_i32_1 = arith.constant 0 : i32
    %c0_i32_2 = arith.constant 0 : i32
    return %c0_i32, %c0_i32_0, %c0_i32_1 : i32, i32, i32
  }
  func.func @transform_2(%arg0: i32, %arg1: i32, %arg2: i32) -> (i32, i32, i32) {
    %c0_i32 = arith.constant 0 : i32
    %c0_i32_0 = arith.constant 0 : i32
    %c0_i32_1 = arith.constant 0 : i32
    %c0_i32_2 = arith.constant 0 : i32
    return %c0_i32, %c0_i32_0, %c0_i32_1 : i32, i32, i32
  }
  func.func @transform_3(%arg0: i32, %arg1: i32, %arg2: i32) -> (i32, i32, i32) {
    %c0_i32 = arith.constant 0 : i32
    %c0_i32_0 = arith.constant 0 : i32
    %c0_i32_1 = arith.constant 0 : i32
    %c0_i32_2 = arith.constant 0 : i32
    return %c0_i32, %c0_i32_0, %c0_i32_1 : i32, i32, i32
  }
  func.func @transform_4(%arg0: i32, %arg1: i32, %arg2: i32) -> (i32, i32, i32) {
    %c0_i32 = arith.constant 0 : i32
    %c0_i32_0 = arith.constant 0 : i32
    %c0_i32_1 = arith.constant 0 : i32
    %c0_i32_2 = arith.constant 0 : i32
    return %c0_i32, %c0_i32_0, %c0_i32_1 : i32, i32, i32
  }
  func.func @transform_5(%arg0: i32, %arg1: i32, %arg2: i32) -> (i32, i32, i32) {
    %c0_i32 = arith.constant 0 : i32
    %c0_i32_0 = arith.constant 0 : i32
    %c0_i32_1 = arith.constant 0 : i32
    %c0_i32_2 = arith.constant 0 : i32
    return %c0_i32, %c0_i32_0, %c0_i32_1 : i32, i32, i32
  }
  func.func @transform_6(%arg0: i32, %arg1: i32, %arg2: i32) -> (i32, i32, i32) {
    %c0_i32 = arith.constant 0 : i32
    %c0_i32_0 = arith.constant 0 : i32
    %c0_i32_1 = arith.constant 0 : i32
    %c0_i32_2 = arith.constant 0 : i32
    return %c0_i32, %c0_i32_0, %c0_i32_1 : i32, i32, i32
  }
  func.func @transform_7(%arg0: i32, %arg1: i32, %arg2: i32) -> (i32, i32, i32) {
    %c0_i32 = arith.constant 0 : i32
    %c0_i32_0 = arith.constant 0 : i32
    %c0_i32_1 = arith.constant 0 : i32
    %c0_i32_2 = arith.constant 0 : i32
    return %c0_i32, %c0_i32_0, %c0_i32_1 : i32, i32, i32
  }
  func.func @transform_8(%arg0: i32, %arg1: i32, %arg2: i32) -> (i32, i32) {
    %c0_i32 = arith.constant 0 : i32
    %c0_i32_0 = arith.constant 0 : i32
    %c0_i32_1 = arith.constant 0 : i32
    return %c0_i32, %c0_i32_0 : i32, i32
  }
  func.func @transform_9(%arg0: i32, %arg1: i32, %arg2: i32) -> (i32, i32, i32) {
    %c0_i32 = arith.constant 0 : i32
    %c0_i32_0 = arith.constant 0 : i32
    return %arg0, %arg1, %c0_i32 : i32, i32, i32
  }
  func.func @transform_10(%arg0: i32, %arg1: i32, %arg2: i32) -> (i32, i32, i32, i32) {
    %c0_i32 = arith.constant 0 : i32
    %c0_i32_0 = arith.constant 0 : i32
    return %arg0, %arg2, %arg1, %c0_i32 : i32, i32, i32, i32
  }
}

</mosaic_0001>

<bundles_post_ra>
// kernel: tpu_custom_call.1
= control target key start
LH: loop header
LB: loop body
LE: loop exit
PB: predicated region body
PF: predicated region fallthrough
CT: control target
= control target key end

     0   :  { %s2450_s0 = inlined_call_operand.hbm [shape: bf16[2,8,32], index: 0, kind: input, shape index: {}]   ;;  %s2451_s1 = inlined_call_operand.hbm [shape: bf16[1,32,32], index: 1, kind: input, shape index: {}]   ;;  %s2452_s2 = inlined_call_operand.vmem [shape: f32[1,1,32], index: 2, kind: input, shape index: {}]   ;;  %s2453_s3 = inlined_call_operand.hbm [shape: bf16[1,32,32], index: 3, kind: input, shape index: {}]   ;;  %s2454_s4 = inlined_call_operand.vmem [shape: f32[1,1,32], index: 4, kind: input, shape index: {}]   ;;  %s2455_s5 = inlined_call_operand.vmem [shape: bf16[1,32,32], index: 5, kind: input, shape index: {}]   ;;  %s2456_s6 = inlined_call_operand.vmem [shape: f32[1,1,32], index: 6, kind: input, shape index: {}]   ;;  %s2457_s7 = inlined_call_operand.hbm [shape: bf16[1,32,32], index: 7, kind: input, shape index: {}]   ;;  %s2458_s8 = inlined_call_operand.vmem [shape: f32[1,32], index: 8, kind: input, shape index: {}]   ;;  %s2459_s9 = inlined_call_operand.hbm [shape: f32[2,8,32], index: 9, kind: output, shape index: {0}]   ;;  %s2460_s10 = inlined_call_operand.hbm [shape: f32[2,4,8,8], index: 10, kind: output, shape index: {1}]  }
   0x1   :  { %2470 = sst [smem:[#allocation21_spill]] %s2456_s6 }
   0x2   :  { %2471 = sst [smem:[#allocation22_spill]] %s2458_s8 }
   0x3   :  { %2472 = sst [smem:[#allocation23_spill]] %s2459_s9 }
   0x4   :  { %2473 = sst [smem:[#allocation24_spill]] %s2460_s10 }
   0x5   :  { %16 = vsyncpa [#allocation3], 0 }
   0x6   :  { %18 = vsyncpa [#allocation3 + $0x1], 0 }
   0x7   :  { %19 = vsyncpa [#allocation6], 0 }
   0x8   :  { %20 = vsyncpa [#allocation9], 0 }
   0x9   :  { %21 = vsyncpa [#allocation4], 0 }
   0xa   :  { %23 = vsyncpa [#allocation4 + $0x1], 0 }
   0xb   :  { %24 = vsyncpa [#allocation12], 0 }
   0xc   :  { %26 = vsyncpa [#allocation12 + $0x1], 0  ;;  %s2015_s13 = smov 0   ;;  %s2017_s14 = smov 0  }
   0xd   :  { %s2019_s15 = smov 0   ;;  %s2021_s16 = smov 0  }
   0xe   :  { %s2023_s17 = smov 0   ;;  %s2025_s18 = smov 0  }
   0xf LB: > { %2474 = sst [smem:[#allocation18_spill]] %s1921_s13  ;;  %s1413_s19 = sadd.s32 4294967295, %s1941_s18   ;;  %s1941_s18 = sphi %s2025_s18, %s32_s18   ;;  %s1937_s17 = sphi %s2023_s17, %s2503_s17   ;;  %s1933_s16 = sphi %s2021_s16, %s2502_s16   ;;  %s1929_s15 = sphi %s2019_s15, %s2501_s15   ;;  %s1925_s14 = sphi %s2017_s14, %s2500_s14   ;;  %s1921_s13 = sphi %s2015_s13, %s2499_s13  }
  0x10   : > { %2475 = sst [smem:[#allocation19_spill]] %s1933_s16  ;;  %s1414_s20 = sadd.s32 4294967294, %s1941_s18  }
  0x11   : > { %p71_p0 = scmp.ne.s32.totalorder %s1925_s14, %s1921_s13  ;;  %p2049_p1 = scmp.eq.s32.totalorder %s1413_s19, 0 }
  0x12   : > { %p2053_p2 = scmp.eq.s32.totalorder %s1413_s19, 1  ;;  %p271_p3 = scmp.eq.s32.totalorder %s1414_s20, 1 }
  0x13   : > { %s2476_s21 = scalar_select %p2049_p1, 1, 0 }
  0x14   : > { %s2477_s22 = scalar_select %p2053_p2, 1, 0 }
  0x15   : > { %p2059_p4 = por %p2049_p1, %p71_p0  ;;  %p1415_p5 = scmp.ge.s32.totalorder %s1941_s18, 1 }
  0x16   : > { %p2064_p6 = por %p271_p3, %p71_p0  ;;  %p308_p7 = scmp.lt.s32.totalorder %s1941_s18, 3 }
  0x17   : > { %s2478_s23 = scalar_select %p2059_p4, 1, 0 }
  0x18   : > { %s2479_s24 = scalar_select %p2064_p6, 1, 0 }
  0x19   : > { %p2069_p8 = pnand %p1415_p5, %p308_p7  ;;  %s1943_s26 = smov [#allocation5]  }
  0x1a   : > { %2480 = sst [smem:[#allocation20_spill]] %s2479_s24  ;;  %s320_s27 = sshll.u32 %s1943_s26, 4  ;;  %s2073_s27 = int_to_ptr.vmem [resolvable:$true] %s320_s27 }
  0x1b   : > { %s2481_s25 = scalar_select %p2069_p8, 1, 0 }
  0x1c   : > { %p1590_p9 = pneg %p2069_p8  ;;  %s1944_s29 = smov [#allocation7]  }
  0x1d   : > { %s336_s30 = sshll.u32 %s1944_s29, 4  ;;  %s1945_s11 = smov [#allocation8]   ;;  %s2084_s30 = int_to_ptr.vmem [resolvable:$true] %s336_s30 }
  0x1e   : > { %p2080_p11 = pnand %p1590_p9, %p2049_p1  ;;  %s2086_s12 = sshll.u32 %s1945_s11, 4  ;;  %s359_s12 = int_to_ptr.vmem [resolvable:$true] %s2086_s12 }
  0x1f   : > { %s1705_s26 = scalar_lea.hbm %s2451_s1, 256 }
  0x20   : > { %p1706_p12 = scmp.ne.s32.totalorder %s2451_s1, %s1705_s26  ;;  %p2096_p13 = pneg %p2080_p11 }
  0x21   : > { %p1712_p5 = scmp.lt.u32.totalorder %s1705_s26, %s2451_s1 }
  0x22   : > { %p1708_p0 = pnand %p2096_p13, %p1706_p12 }
  0x24   : > { %p1709_p3 = pneg %p1708_p0 }
  0x26   : > { %p1714_p7 = pnand %p1712_p5, %p1709_p3 }
  0x28   : > { %1717 = shalt.err (!%p1714_p7)
}
  0x29   : > { %s1718_s13 = scalar_lea.vmem %s2073_s27, 256  ;;  %p1726_p1 = scmp.lt.s32.totalorder %s2073_s27, %s2073_s27 }
  0x2a   : > { %p1719_p9 = scmp.ne.s32.totalorder %s2073_s27, %s1718_s13  ;;  %p1727_p4 = scmp.lt.s32.totalorder %s1718_s13, %s1718_s13 }
  0x2c   : > { %p1721_p10 = pnand %p1719_p9, %p2096_p13  ;;  %p1728_p12 = por %p1727_p4, %p1726_p1 }
  0x2e   : > { %p1722_p6 = pneg %p1721_p10 }
  0x30   : > { %p1729_p0 = pnand %p1728_p12, %p1722_p6 }
  0x32   : > { %1732 = shalt.err (!%p1729_p0)
}
  0x33   : > { %s1946_s24 = smov 64   ;;  %s1947_s19 = smov 4  }
  0x34   : > { %1593 = dma.hbm_to_vmem [thread:$0]  (!%p2080_p11), %s2451_s1, 256, %s2073_s27, [#allocation6], %s1946_s24, %s1946_s24, %s1947_s19  }
  0x35   : > { %s1733_s13 = scalar_lea.hbm %s2453_s3, 256 }
  0x36   : > { %p1734_p1 = scmp.ne.s32.totalorder %s2453_s3, %s1733_s13  ;;  %p1740_p10 = scmp.lt.u32.totalorder %s1733_s13, %s2453_s3 }
  0x38   : > { %p1736_p4 = pnand %p1734_p1, %p2096_p13 }
  0x3a   : > { %p1737_p6 = pneg %p1736_p4 }
  0x3c   : > { %p1742_p3 = pnand %p1740_p10, %p1737_p6 }
  0x3e   : > { %1745 = shalt.err (!%p1742_p3)
}
  0x3f   : > { %s1746_s27 = scalar_lea.vmem %s2084_s30, 256  ;;  %p1754_p12 = scmp.lt.s32.totalorder %s2084_s30, %s2084_s30 }
  0x40   : > { %p1747_p5 = scmp.ne.s32.totalorder %s2084_s30, %s1746_s27  ;;  %p1755_p0 = scmp.lt.s32.totalorder %s1746_s27, %s1746_s27 }
  0x42   : > { %p1749_p7 = pnand %p1747_p5, %p2096_p13  ;;  %p1756_p1 = por %p1755_p0, %p1754_p12 }
  0x44   : > { %p1750_p9 = pneg %p1749_p7 }
  0x46   : > { %p1757_p4 = pnand %p1756_p1, %p1750_p9 }
  0x48   : > { %1760 = shalt.err (!%p1757_p4)
}
  0x49   : > { %1596 = dma.hbm_to_vmem [thread:$0]  (!%p2080_p11), %s2453_s3, 256, %s2084_s30, [#allocation6], %s1946_s24, %s1946_s24, %s1947_s19  }
  0x4a   : > { %s1761_s20 = scalar_lea.hbm %s2457_s7, 256 }
  0x4b   : > { %p1762_p6 = scmp.ne.s32.totalorder %s2457_s7, %s1761_s20  ;;  %p1768_p5 = scmp.lt.u32.totalorder %s1761_s20, %s2457_s7 }
  0x4d   : > { %p1764_p10 = pnand %p1762_p6, %p2096_p13 }
  0x4f   : > { %p1765_p3 = pneg %p1764_p10 }
  0x51   : > { %p1770_p7 = pnand %p1768_p5, %p1765_p3 }
  0x53   : > { %1773 = shalt.err (!%p1770_p7)
}
  0x54   : > { %s1774_s27 = scalar_lea.vmem %s359_s12, 256  ;;  %p1782_p1 = scmp.lt.s32.totalorder %s359_s12, %s359_s12 }
  0x55   : > { %p1775_p9 = scmp.ne.s32.totalorder %s359_s12, %s1774_s27  ;;  %p1783_p4 = scmp.lt.s32.totalorder %s1774_s27, %s1774_s27 }
  0x57   : > { %p1777_p12 = pnand %p1775_p9, %p2096_p13  ;;  %p1784_p8 = por %p1783_p4, %p1782_p1 }
  0x59   : > { %p1778_p0 = pneg %p1777_p12 }
  0x5b   : > { %p1785_p2 = pnand %p1784_p8, %p1778_p0 }
  0x5d   : > { %1788 = shalt.err (!%p1785_p2)
}
  0x5e   : > { %1599 = dma.hbm_to_vmem [thread:$0]  (!%p2080_p11), %s2457_s7, 256, %s359_s12, [#allocation9], %s1946_s24, %s1946_s24, %s1947_s19  }
  0x5f   : > { %s58_s9 = sadd.s32 1, %s1929_s15  ;;  %s51_s28 = sadd.s32 1, %s1937_s17 }
  0x60   : > { %p65_p2 = scmp.ne.s32.totalorder %s1929_s15, %s1925_s14  ;;  %p53_p8 = scmp.ge.s32.totalorder %s51_s28, 2 }
  0x61   : > { %p66_p13 = scmp.eq.s32.totalorder %s1941_s18, 0  ;;  %p2484_p6 = scmp.ne.s32.totalorder %s2477_s22, 0 }
  0x62   : > { %p1614_p3 = scmp.lt.s32.totalorder %s1941_s18, 2  ;;  %s2505_s28 = smov (%p53_p8, %s51_s28), 0 }
  0x63   : > { %p2175_p10 = por %p2484_p6, %p65_p2  ;;  %p67_p5 = por %p66_p13, %p65_p2 }
  0x64   : > { %s375_s10 = sand.u32 1, %s1929_s15   ;;  %s55_s16 = ssub.s32 %s1937_s17, %s2505_s28 }
  0x65   : > { %p56_p7 = scmp.eq.s32.totalorder %s55_s16, 0  ;;  %s1420_s12 = sshll.u32 %s375_s10, 2 }
  0x66   : > { %s1421_s24 = sshll.u32 %s1937_s17, 6  ;;  %s379_s29 = scalar_lea.vmem [#allocation2], %s1420_s12 }
  0x67   : > { %s2187_s19 = scalar_select %p56_p7, %s1929_s15, %s58_s9  }
  0x68   : > { %s2192_s22 = scalar_lea.hbm %s2450_s0, %s1421_s24  ;;  %s386_s11 = sshll.u32 %s379_s29, 4  ;;  %s2194_s11 = int_to_ptr.vmem [resolvable:$true] %s386_s11 }
  0x69   : > { %p2198_p11 = pnand %p1614_p3, %p67_p5  ;;  %s376_s27 = scalar_lea.sflag [#allocation3], %s375_s10 }
  0x6a   : > { %s1789_s30 = scalar_lea.hbm %s2192_s22, 64  ;;  %s1794_s16 = scalar_lea.hbm %s2450_s0, 128 }
  0x6b   : > { %p1790_p9 = scmp.ne.s32.totalorder %s2192_s22, %s1789_s30  ;;  %p1791_p12 = pneg %p2198_p11 }
  0x6c   : > { %p1795_p4 = scmp.lt.u32.totalorder %s2192_s22, %s2450_s0  ;;  %p1796_p2 = scmp.lt.u32.totalorder %s1794_s16, %s1789_s30 }
  0x6d   : > { %p1792_p0 = pnand %p1791_p12, %p1790_p9  ;;  %p1798_p13 = scmp.lt.u32.totalorder %s1789_s30, %s2192_s22 }
  0x6e   : > { %p1797_p8 = por %p1796_p2, %p1795_p4 }
  0x6f   : > { %p1793_p1 = pneg %p1792_p0 }
  0x70   : > { %p1799_p6 = por %p1798_p13, %p1797_p8 }
  0x72   : > { %p1800_p3 = pnand %p1799_p6, %p1793_p1 }
  0x74   : > { %1803 = shalt.err (!%p1800_p3)
}
  0x75   : > { %s1804_s10 = scalar_lea.vmem %s2194_s11, 64  ;;  %s1948_s20 = smov [#allocation2]  }
  0x76   : > { %p1805_p5 = scmp.ne.s32.totalorder %s2194_s11, %s1804_s10  ;;  %s1809_s26 = sshll.u32 %s1948_s20, 4  ;;  %s1810_s26 = int_to_ptr.vmem [resolvable:$false] %s1809_s26 }
  0x77   : > { %s1811_s29 = scalar_lea.vmem %s1810_s26, 128  ;;  %p1812_p0 = scmp.lt.s32.totalorder %s2194_s11, %s1810_s26 }
  0x78   : > { %p1807_p7 = pnand %p1805_p5, %p1791_p12  ;;  %p1813_p4 = scmp.lt.s32.totalorder %s1811_s29, %s1804_s10 }
  0x7a   : > { %p1808_p9 = pneg %p1807_p7  ;;  %p1814_p2 = por %p1813_p4, %p1812_p0 }
  0x7c   : > { %p1815_p8 = pnand %p1814_p2, %p1808_p9 }
  0x7e   : > { %1818 = shalt.err (!%p1815_p8)
}
  0x7f   : > { %1603 = dma.hbm_to_vmem [thread:$0]  (!%p2198_p11), %s2192_s22, 64, %s2194_s11, %s376_s27  }
  0x80   : > { %p2487_p1 = scmp.ne.s32.totalorder %s2481_s25, 0 }
  0x81   : > { %s2230_s30 = sand.u32 (!%p2487_p1), 1, %s1925_s14   ;;  %p2488_p12 = scmp.ne.s32.totalorder (!%p2487_p1), %s2478_s23, 0 }
  0x82   : > { %395 = sbr.rel (%p2487_p1) target bundleno = 1595 (0x63b), region = 56  ;;  %s1423_s6 = sshll.u32 (!%p2487_p1), %s2230_s30, 2 }
  0x83   : > { %s398_s9 = scalar_lea.sflag (!%p2487_p1), [#allocation3], %s2230_s30  ;;  %s401_s16 = scalar_lea.vmem (!%p2487_p1), [#allocation2], %s1423_s6 }
  0x89   : > { %1900 = dma.done.wait (%p2488_p12), %s398_s9, 64  }
  0x8a   : > { %1902 = vsyncadd (%p2488_p12), %s398_s9, 4294967232  ;;  %p2489_p13 = scmp.ne.s32.totalorder %s2476_s21, 0 }
  0x8c   : > { %1904 = dma.done.wait (%p2489_p13), [#allocation6], 512  }
  0x8d   : > { %1906 = vsyncadd (%p2489_p13), [#allocation6], 4294966784 }
  0x8e   : > { %1908 = dma.done.wait (%p2489_p13), [#allocation9], 256  }
  0x8f   : > { %1910 = vsyncadd (%p2489_p13), [#allocation9], 4294967040  ;;  %v1949_v0 = vmov 0.0   ;;  %vm1950_vm0 = vmmov 0   ;;  %v1681_v1 = vld [vmem:[#allocation7] sm:$0xff]   ;;  %v1682_v2 = vld [vmem:[#allocation5] sm:$0xff]  }
  0x90   : > { %1500 = vmatprep.subr.bf16.mxu1 %v1949_v0  ;;  %1492 = vmatprep.subr.bf16.mxu0 %v1949_v0  ;;  %v1683_v3 = vld [vmem:[#allocation7 + $0x8] sm:$0xff]   ;;  %v1684_v4 = vld [vmem:[#allocation5 + $0x8] sm:$0xff]   ;;  %vm503_vm1 = vcmask 261120   ;;  %vm674_vm2 = vcmask 64512   ;;  %s1951_s11 = smov 112   ;;  %s1952_s13 = smov 120  }
  0x91   : > { %1504 = vmatprep.mubr.msk.bf16.mxu1 %vm1950_vm0, %v1949_v0  ;;  %1496 = vmatprep.mubr.msk.bf16.mxu0 %vm1950_vm0, %v1949_v0  ;;  %v457_v5 = vld [vmem:[%s401_s16] sm:$0xf]  ;;  %v1433_v7 = vld [vmem:[%s2454_s4] ss:$0 sm:$0xff]  ;;  %s1953_s27 = smov 104   ;;  %v1686_v24 = vld [vmem:[%s2455_s5 + $0x8] sm:$0xff]  }
  0x92   : > { %1501 = vmatpush3.bf16.msra.mxu1 %v1681_v1  ;;  %1493 = vmatpush3.bf16.msra.mxu0 %v1682_v2  ;;  %v463_v6 = vld [vmem:[%s401_s16] sm:$0xf]  ;;  %v1429_v8 = vld [vmem:[%s2452_s2] ss:$0 sm:$0xff]  ;;  %s2490_s6 = sld [smem:[#allocation21_spill]]  ;;  %vm737_vm3 = vcmask 1043456  }
  0x93   : > { %1502 = vmatprep.subr.bf16.mxu1 %v1949_v0  ;;  %1494 = vmatprep.subr.bf16.mxu0 %v1949_v0  ;;  %v1685_v23 = vld [vmem:[%s2455_s5] sm:$0xff]   ;;  %s1428_s9 = sshll.u32 %s2230_s30, 5  ;;  %s1954_s21 = smov 8   ;;  %vm1133_vm4 = vcmask 130048   ;;  %vm1135_vm5 = vcmask 195584  }
  0x94   : > { %s2322_s16 = scalar_lea.vmem [#allocation11], %s1428_s9  ;;  %s1955_s23 = smov 16  }
  0x95   : > { %s1956_s25 = smov 24   ;;  %s2491_s22 = sld [smem:[#allocation19_spill]] }
  0x96   : > { %1503 = vmatpush3.bf16.msra.mxu1 %v1683_v3  ;;  %1495 = vmatpush3.bf16.msra.mxu0 %v1684_v4  ;;  %s2492_s12 = sld [smem:[#allocation22_spill]]  ;;  %s1250_s20 = sshll.u32 %s2322_s16, 4  ;;  %s2366_s20 = int_to_ptr.vmem [resolvable:$true] %s1250_s20 }
  0x97   : > { %1516 = vmatprep.subr.bf16.mxu1 %v1949_v0  ;;  %1508 = vmatprep.subr.bf16.mxu0 %v1949_v0 }
  0x98   : > { %v1437_v39 = vld [vmem:[%s2490_s6] ss:$0 sm:$0xff]  ;;  %s2493_s6 = sld [smem:[#allocation24_spill]] }
  0x99   : > { %1505 = vmatmul.mubr.msk.bf16.vlgmr.msra.gmra.mrb[0].mxu1 %vm503_vm1, %v457_v5  ;;  %1497 = vmatmul.mubr.msk.bf16.vlgmr.msra.gmra.mrb[0].mxu0 %vm503_vm1, %v463_v6 }
  0x9a   : > { %1518 = vmatprep.mubr.msk.bf16.mxu1 %vm1950_vm0, %v1949_v0  ;;  %1512 = vmatprep.mubr.msk.bf16.mxu0 %vm1950_vm0, %v1949_v0 }
  0x9b   : > { %1509 = vmatpush3.bf16.msra.mxu0 %v1685_v23  ;;  %s1463_s10 = sshll.u32 %s2491_s22, 9 }
  0x9c   : > { %1510 = vmatprep.subr.bf16.mxu0 %v1949_v0 }
  0x9e   : > { %s2364_s9 = scalar_lea.hbm %s2493_s6, %s1463_s10 }
  0x9f   : > { %1511 = vmatpush3.bf16.msra.mxu0 %v1686_v24 }
  0xa0   : > { %1522 = vmatprep.subr.bf16.mxu0 %v1949_v0 }
  0xa2   : > { %1513 = vmatmul.mubr.msk.bf16.vlgmr.msra.gmra.mrb[4].mxu0 %vm503_vm1, %v457_v5 }
  0xa3   : > { %1524 = vmatprep.mubr.msk.bf16.mxu0 %vm1950_vm0, %v1949_v0 }
 0x16c   : > { %v604_v9 = vpop.f32.mrb[0].mxu1  ;;  %v541_v12 = vpop.f32.mrb[0].mxu0 }
 0x16d   : > { %v605_v10 = vadd.f32 %v1433_v7, %v604_v9  ;;  %v1506_v11 = vpop.f32.mrb[1].mxu1  ;;  %v542_v13 = vadd.f32 %v1429_v8, %v541_v12  ;;  %v1498_v15 = vpop.f32.mrb[1].mxu0 }
 0x16e   : > { %v607_v14 = vpop.f32.mrb[2].mxu1  ;;  %v544_v18 = vpop.f32.mrb[2].mxu0 }
 0x16f   : > { %v672_v16 = vpack.c.bf16 %v605_v10, %v605_v10  ;;  %v1507_v17 = vpop.f32.mrb[3].mxu1  ;;  %v670_v19 = vmul.f32 0.35355338, %v542_v13  ;;  %v1499_v20 = vpop.f32.mrb[3].mxu0 }
 0x171   : > { %898 = vrot.lane.b32.xlu1 %v672_v16, %s1951_s11  ;;  %785 = vrot.lane.b32.xlu0 %v672_v16, %s1952_s13  ;;  %v679_v21 = vsel %vm674_vm2, %v672_v16, 0  ;;  %v671_v22 = vpack.c.bf16 %v670_v19, %v670_v19 }
 0x172   : > { %1517 = vmatpush3.bf16.xpose.msra.mxu1 %v679_v21 }
 0x173   : > { %1528 = vmatprep.subr.bf16.mxu1 %v1949_v0 }
 0x175   : > { %896 = vrot.lane.b32.xlu1 %v671_v22, %s1951_s11  ;;  %782 = vrot.lane.b32.xlu0 %v671_v22, %s1952_s13  ;;  %v664_v40 = vpop.f32.mrb[4].mxu0 }
 0x176   : > { %v665_v41 = vadd.f32 %v1437_v39, %v664_v40  ;;  %v1514_v42 = vpop.f32.mrb[5].mxu0 }
 0x177   : > { %v667_v43 = vpop.f32.mrb[6].mxu0 }
 0x178   : > { %v673_v44 = vpack.c.bf16 %v665_v41, %v665_v41  ;;  %v1515_v45 = vpop.f32.mrb[7].mxu0 }
 0x179   : > { %1008 = vrot.lane.b32.xlu1 %v671_v22, %s1953_s27  ;;  %1010 = vrot.lane.b32.xlu0 %v672_v16, %s1953_s27  ;;  %v1687_v45 = vld [vmem:[#allocation8] sm:$0xff]  }
 0x17a   : > { %1519 = vmatmul.mubr.msk.bf16.vlgmr.msra.gmra.mrb[4].mxu1 %vm674_vm2, %v671_v22  ;;  %v739_v46 = vsel %vm737_vm3, %v673_v44, 0 }
 0x17b   : > { %1530 = vmatprep.mubr.msk.bf16.mxu1 %vm1950_vm0, %v1949_v0  ;;  %1523 = vmatpush3.bf16.msra.mxu0 %v739_v46 }
 0x17c   : > { %1534 = vmatprep.subr.bf16.mxu0 %v1949_v0 }
 0x1e3   : > { %v786_v25 = vpop.permute.xlu0 %785  ;;  %v899_v27 = vpop.permute.xlu1 %898 }
 0x1e4   : > { %v791_v26 = vsel %vm674_vm2, %v786_v25, 0  ;;  %v904_v29 = vsel %vm674_vm2, %v899_v27, 0 }
 0x1e5   : > { %1529 = vmatpush3.bf16.xpose.msra.mxu1 %v791_v26 }
 0x1e6   : > { %1540 = vmatprep.subr.bf16.mxu1 %v1949_v0 }
 0x1e7   : > { %v783_v28 = vpop.permute.xlu0 %782  ;;  %v897_v31 = vpop.permute.xlu1 %896 }
 0x1eb   : > { %v1011_v30 = vpop.permute.xlu0 %1010  ;;  %v1009_v33 = vpop.permute.xlu1 %1008 }
 0x1ec   : > { %1531 = vmatmul.mubr.msk.bf16.vlgmr.msra.gmra.mrb[8].mxu1 %vm674_vm2, %v783_v28  ;;  %v1016_v32 = vsel %vm674_vm2, %v1011_v30, 0 }
 0x1ed   : > { %1541 = vmatpush3.bf16.xpose.msra.mxu1 %v904_v29  ;;  %1542 = vmatprep.mubr.msk.bf16.mxu1 %vm1950_vm0, %v1949_v0 }
 0x1ee   : > { %1552 = vmatprep.subr.bf16.mxu1 %v1949_v0 }
 0x1f4   : > { %1543 = vmatmul.mubr.msk.bf16.vlgmr.msra.gmra.mrb[12].mxu1 %vm674_vm2, %v897_v31 }
 0x1f5   : > { %1553 = vmatpush3.bf16.xpose.msra.mxu1 %v1016_v32  ;;  %1554 = vmatprep.mubr.msk.bf16.mxu1 %vm1950_vm0, %v1949_v0 }
 0x1f6   : > { %1564 = vmatprep.subr.bf16.mxu1 %v1949_v0 }
 0x1fc   : > { %1555 = vmatmul.mubr.msk.bf16.vlgmr.msra.gmra.mrb[16].mxu1 %vm674_vm2, %v1009_v33 }
 0x1fd   : > { %1568 = vmatprep.mubr.msk.bf16.mxu1 %vm1950_vm0, %v1949_v0  ;;  %1565 = vmatpush3.bf16.msra.mxu1 %v1687_v45 }
 0x1fe   : > { %1566 = vmatprep.subr.bf16.mxu1 %v1949_v0 }
 0x24d   : > { %v715_v34 = vpop.f32.mrb[4].mxu1 }
 0x24e   : > { %v1520_v35 = vpop.f32.mrb[5].mxu1  ;;  %v721_v36 = vsel %vm674_vm2, %v715_v34, -inf }
 0x24f   : > { %722 = vmax.xlane.f32.xlu0 %v721_v36  ;;  %v718_v37 = vpop.f32.mrb[6].mxu1 }
 0x250   : > { %v1521_v38 = vpop.f32.mrb[7].mxu1 }
 0x2bf   : > { %v827_v47 = vpop.f32.mrb[8].mxu1 }
 0x2c0   : > { %v1532_v48 = vpop.f32.mrb[9].mxu1  ;;  %v833_v49 = vsel %vm674_vm2, %v827_v47, -inf }
 0x2c1   : > { %834 = vmax.xlane.f32.xlu1 %v833_v49  ;;  %v830_v50 = vpop.f32.mrb[10].mxu1 }
 0x2c2   : > { %v1533_v51 = vpop.f32.mrb[11].mxu1  ;;  %v1688_v50 = vld [vmem:[#allocation8 + $0x8] sm:$0xff]  }
 0x2c3   : > { %1567 = vmatpush3.bf16.msra.mxu1 %v1688_v50 }
 0x2c7   : > { %v940_v52 = vpop.f32.mrb[12].mxu1 }
 0x2c8   : > { %v1544_v53 = vpop.f32.mrb[13].mxu1  ;;  %v946_v54 = vsel %vm674_vm2, %v940_v52, -inf }
 0x2c9   : > { %947 = vmax.xlane.f32.xlu0 %v946_v54  ;;  %v943_v55 = vpop.f32.mrb[14].mxu1 }
 0x2ca   : > { %v1545_v56 = vpop.f32.mrb[15].mxu1 }
 0x2cf   : > { %v1052_v57 = vpop.f32.mrb[16].mxu1 }
 0x2d0   : > { %v1556_v58 = vpop.f32.mrb[17].mxu1  ;;  %v1058_v59 = vsel %vm674_vm2, %v1052_v57, -inf }
 0x2d1   : > { %1059 = vmax.xlane.f32.xlu0 %v1058_v59  ;;  %v1055_v60 = vpop.f32.mrb[18].mxu1 }
 0x2d2   : > { %v1557_v61 = vpop.f32.mrb[19].mxu1 }
 0x2dc   : > { %v723_v62 = vpop.xlane.xlu0 %722 }
 0x2dd   : > { %v724_v63 = vsub.f32 %v715_v34, %v723_v62 }
 0x2df   : > { %v725_v1 = vmul.f32 1.442695, %v724_v63 }
 0x2e1   : > { %1689 = vpow2.f32 %v725_v1 }
 0x2eb   : > { %v1690_v2 = vpop.eup %1689 }
 0x2ec   : > { %v727_v3 = vsel %vm674_vm2, %v1690_v2, 0.0 }
 0x2ed   : > { %728 = vadd.xlane.f32.xlu1 %v727_v3 }
 0x2fe   : > { %848 = vrot.lane.b32.xlu1 %v673_v44, %s1952_s13 }
 0x34e   : > { %v835_v4 = vpop.xlane.xlu1 %834 }
 0x34f   : > { %v836_v5 = vsub.f32 %v827_v47, %v835_v4 }
 0x351   : > { %v837_v6 = vmul.f32 1.442695, %v836_v5 }
 0x353   : > { %1691 = vpow2.f32 %v837_v6 }
 0x356   : > { %v948_v7 = vpop.xlane.xlu0 %947 }
 0x357   : > { %v949_v8 = vsub.f32 %v940_v52, %v948_v7 }
 0x359   : > { %v950_v9 = vmul.f32 1.442695, %v949_v8 }
 0x35b   : > { %1693 = vpow2.f32 %v950_v9 }
 0x35d   : > { %v1692_v10 = vpop.eup %1691 }
 0x35e   : > { %v1060_v11 = vpop.xlane.xlu0 %1059  ;;  %v839_v12 = vsel %vm674_vm2, %v1692_v10, 0.0 }
 0x35f   : > { %v1061_v13 = vsub.f32 %v1052_v57, %v1060_v11  ;;  %840 = vadd.xlane.f32.xlu0 %v839_v12 }
 0x361   : > { %v1062_v14 = vmul.f32 1.442695, %v1061_v13 }
 0x363   : > { %1695 = vpow2.f32 %v1062_v14 }
 0x365   : > { %v1694_v15 = vpop.eup %1693 }
 0x366   : > { %v952_v16 = vsel %vm674_vm2, %v1694_v15, 0.0 }
 0x367   : > { %953 = vadd.xlane.f32.xlu1 %v952_v16 }
 0x36d   : > { %v1696_v17 = vpop.eup %1695 }
 0x36e   : > { %v1064_v18 = vsel %vm674_vm2, %v1696_v17, 0.0 }
 0x36f   : > { %1065 = vadd.xlane.f32.xlu0 %v1064_v18 }
 0x378   : > { %1072 = vrot.lane.b32.xlu1 %v673_v44, %s1953_s27 }
 0x37a   : > { %v729_v19 = vpop.xlane.xlu1 %728 }
 0x37b   : > { %1697 = vrcp.f32 %v729_v19 }
 0x37e   : > { %v849_v21 = vpop.permute.xlu1 %848 }
 0x37f   : > { %v854_v24 = vsel %vm737_vm3, %v849_v21, 0 }
 0x385   : > { %v1698_v20 = vpop.eup %1697  ;;  %960 = vrot.lane.b32.xlu0 %v673_v44, %s1951_s11  ;;  %s1427_s11 = sshll.u32 %s2230_s30, 3 }
 0x386   : > { %v731_v22 = vmul.f32 %v1698_v20, %v1690_v2  ;;  %v1455_v2 = vld [vmem:[%s2492_s12] ss:$0 sm:$0xff]  ;;  %s2355_s24 = scalar_lea.vmem [#allocation10], %s1427_s11  ;;  %s1957_s11 = smov [#allocation11]  }
 0x387   : > { %1210 = vst.msk [vmem:[%s2355_s24] sm:$0xff] %vm503_vm1, %v1455_v2  ;;  %s1823_s13 = sshll.u32 %s1957_s11, 4  ;;  %s1824_s13 = int_to_ptr.vmem [resolvable:$false] %s1823_s13 }
 0x388   : > { %732 = vst.msk [vmem:[%s2322_s16] sm:$0xff] %vm674_vm2, %v731_v22  ;;  %v733_v23 = vpack.c.bf16 %v731_v22, %v731_v22  ;;  %p1826_p5 = scmp.lt.s32.totalorder %s2366_s20, %s1824_s13 }
 0x38a   : > { %1525 = vmatmul.mubr.msk.bf16.vlgmr.msra.gmra.mrb[8].mxu0 %vm674_vm2, %v733_v23 }
 0x38b   : > { %1535 = vmatpush3.bf16.msra.mxu0 %v854_v24  ;;  %1536 = vmatprep.mubr.msk.bf16.mxu0 %vm1950_vm0, %v1949_v0 }
 0x38c   : > { %1546 = vmatprep.subr.bf16.mxu0 %v1949_v0 }
 0x3ec   : > { %v841_v25 = vpop.xlane.xlu0 %840 }
 0x3ed   : > { %1699 = vrcp.f32 %v841_v25 }
 0x3f4   : > { %v954_v26 = vpop.xlane.xlu1 %953 }
 0x3f5   : > { %1701 = vrcp.f32 %v954_v26 }
 0x3f7   : > { %v1700_v27 = vpop.eup %1699 }
 0x3f8   : > { %v843_v28 = vmul.f32 %v1700_v27, %v1692_v10  ;;  %v1073_v35 = vpop.permute.xlu1 %1072 }
 0x3f9   : > { %v1078_v37 = vsel %vm737_vm3, %v1073_v35, 0 }
 0x3fa   : > { %1444 = vst.msk [vmem:[%s2322_s16 + $0x8] sm:$0xff] %vm674_vm2, %v843_v28  ;;  %v846_v29 = vpack.c.bf16 %v843_v28, %v843_v28 }
 0x3fc   : > { %1537 = vmatmul.mubr.msk.bf16.vlgmr.msra.gmra.mrb[12].mxu0 %vm674_vm2, %v846_v29  ;;  %v1066_v30 = vpop.xlane.xlu0 %1065 }
 0x3fd   : > { %1703 = vrcp.f32 %v1066_v30  ;;  %1548 = vmatprep.mubr.msk.bf16.mxu0 %vm1950_vm0, %v1949_v0 }
 0x3ff   : > { %v1702_v31 = vpop.eup %1701 }
 0x400   : > { %v956_v32 = vmul.f32 %v1702_v31, %v1694_v15  ;;  %v961_v33 = vpop.permute.xlu0 %960 }
 0x401   : > { %v966_v34 = vsel %vm737_vm3, %v961_v33, 0 }
 0x402   : > { %1447 = vst.msk [vmem:[%s2322_s16 + $0x10] sm:$0xff] %vm674_vm2, %v956_v32  ;;  %1547 = vmatpush3.bf16.msra.mxu0 %v966_v34  ;;  %v959_v36 = vpack.c.bf16 %v956_v32, %v956_v32 }
 0x403   : > { %1558 = vmatprep.subr.bf16.mxu0 %v1949_v0 }
 0x405   : > { %1549 = vmatmul.mubr.msk.bf16.vlgmr.msra.gmra.mrb[16].mxu0 %vm674_vm2, %v959_v36 }
 0x406   : > { %1559 = vmatpush3.bf16.msra.mxu0 %v1078_v37  ;;  %1560 = vmatprep.mubr.msk.bf16.mxu0 %vm1950_vm0, %v1949_v0 }
 0x407   : > { %v1704_v38 = vpop.eup %1703 }
 0x408   : > { %v1068_v39 = vmul.f32 %v1704_v38, %v1696_v17 }
 0x40a   : > { %1450 = vst.msk [vmem:[%s2322_s16 + $0x18] sm:$0xff] %vm674_vm2, %v1068_v39  ;;  %v1071_v40 = vpack.c.bf16 %v1068_v39, %v1068_v39  ;;  %s1825_s16 = scalar_lea.vmem %s1824_s13, 1024 }
 0x40d   : > { %1561 = vmatmul.mubr.msk.bf16.vlgmr.msra.gmra.mrb[20].mxu0 %vm674_vm2, %v1071_v40 }
 0x45d   : > { %v775_v41 = vpop.f32.mrb[8].mxu0 }
 0x45e   : > { %v1526_v42 = vpop.f32.mrb[9].mxu0 }
 0x45f   : > { %v778_v43 = vpop.f32.mrb[10].mxu0 }
 0x460   : > { %v1527_v44 = vpop.f32.mrb[11].mxu0 }
 0x4cf   : > { %v890_v46 = vpop.f32.mrb[12].mxu0 }
 0x4d0   : > { %1121 = vrot.lane.b32.xlu1 %v890_v46, %s1954_s21  ;;  %v1538_v47 = vpop.f32.mrb[13].mxu0 }
 0x4d1   : > { %v893_v48 = vpop.f32.mrb[14].mxu0 }
 0x4d2   : > { %v1539_v49 = vpop.f32.mrb[15].mxu0 }
 0x4d8   : > { %v1002_v51 = vpop.f32.mrb[16].mxu0 }
 0x4d9   : > { %1125 = vrot.lane.b32.xlu0 %v1002_v51, %s1955_s23  ;;  %v1550_v52 = vpop.f32.mrb[17].mxu0  ;;  %s1220_s23 = scalar_lea.sflag [#allocation12], %s2230_s30 }
 0x4da   : > { %v1005_v53 = vpop.f32.mrb[18].mxu0 }
 0x4db   : > { %v1551_v54 = vpop.f32.mrb[19].mxu0 }
 0x4e0   : > { %v1114_v55 = vpop.f32.mrb[20].mxu0 }
 0x4e1   : > { %1129 = vrot.lane.b32.xlu1 %v1114_v55, %s1956_s25  ;;  %v1562_v56 = vpop.f32.mrb[21].mxu0  ;;  %s1819_s25 = scalar_lea.vmem %s2366_s20, 512 }
 0x4e2   : > { %v1117_v0 = vpop.f32.mrb[22].mxu0  ;;  %p1820_p11 = scmp.ne.s32.totalorder %s2366_s20, %s1819_s25  ;;  %p1827_p7 = scmp.lt.s32.totalorder %s1825_s16, %s1819_s25 }
 0x4e3   : > { %v1563_v57 = vpop.f32.mrb[23].mxu0 }
 0x4e4   : > { %p1821_p6 = pnand %p1820_p11, %p2175_p10  ;;  %p1828_p9 = por %p1827_p7, %p1826_p5 }
 0x4e6   : > { %p1822_p3 = pneg %p1821_p6 }
 0x4e8   : > { %p1829_p0 = pnand %p1828_p9, %p1822_p3 }
 0x542   : > { %v1122_v58 = vpop.permute.xlu1 %1121 }
 0x543   : > { %v1132_v60 = vsel %vm674_vm2, %v775_v41, %v1122_v58 }
 0x54b   : > { %v1126_v59 = vpop.permute.xlu0 %1125 }
 0x54c   : > { %v1134_v61 = vsel %vm1133_vm4, %v1132_v60, %v1126_v59 }
 0x553   : > { %v1130_v62 = vpop.permute.xlu1 %1129 }
 0x554   : > { %v1136_v63 = vsel %vm1135_vm5, %v1134_v61, %v1130_v62 }
 0x555   : > { %v1137_v1 = vpack.c.bf16 %v1136_v63, %v1136_v63 }
 0x557   : > { %1569 = vmatmul.mubr.msk.bf16.vlgmr.msra.gmra.mrb[20].mxu1 %vm503_vm1, %v1137_v1 }
 0x558   : > { %1832 = shalt.err (!%p1829_p0)
}
 0x559   : > { %s1833_s27 = scalar_lea.hbm %s2364_s9, 512  ;;  %s1837_s26 = scalar_lea.hbm %s2493_s6, 1024 }
 0x55a   : > { %p1834_p4 = scmp.ne.s32.totalorder %s2364_s9, %s1833_s27  ;;  %p1838_p1 = scmp.lt.u32.totalorder %s2364_s9, %s2493_s6 }
 0x55b   : > { %p1839_p12 = scmp.lt.u32.totalorder %s1837_s26, %s1833_s27  ;;  %p1841_p11 = scmp.lt.u32.totalorder %s1833_s27, %s2364_s9 }
 0x55c   : > { %p1835_p2 = pnand %p1834_p4, %p2175_p10 }
 0x55d   : > { %p1840_p13 = por %p1839_p12, %p1838_p1 }
 0x55e   : > { %p1836_p8 = pneg %p1835_p2 }
 0x55f   : > { %p1842_p6 = por %p1841_p11, %p1840_p13 }
 0x561   : > { %p1843_p3 = pnand %p1842_p6, %p1836_p8 }
 0x563   : > { %1846 = shalt.err (!%p1843_p3)
}
 0x564   : > { %s1958_s25 = smov 128   ;;  %v1211_v3 = vld [vmem:[%s2355_s24] sm:$0xff]  ;;  %s1458_s13 = sshll.u32 %s2491_s22, 7 }
 0x565   : > { %1587 = dma.vmem_to_hbm [thread:$0]  (%p2175_p10), %s2366_s20, 512, %s2364_s9, %s1220_s23, %s1958_s25, %s1958_s25, %s1954_s21  }
 0x566   : > { %s1234_s16 = sshll.u32 %s2355_s24, 4  ;;  %s2494_s10 = sld [smem:[#allocation23_spill]]  ;;  %s2401_s16 = int_to_ptr.vmem [resolvable:$true] %s1234_s16 }
 0x567   : > { %s1215_s21 = scalar_lea.sflag [#allocation4], %s2230_s30  ;;  %s1847_s22 = scalar_lea.vmem %s2401_s16, 128 }
 0x568   : > { %p1848_p5 = scmp.ne.s32.totalorder %s2401_s16, %s1847_s22  ;;  %s1959_s20 = smov [#allocation10]  }
 0x569   : > { %s1851_s9 = sshll.u32 %s1959_s20, 4  ;;  %s1852_s9 = int_to_ptr.vmem [resolvable:$false] %s1851_s9 }
 0x56a   : > { %p1849_p7 = pnand %p1848_p5, %p2175_p10  ;;  %s1853_s23 = scalar_lea.vmem %s1852_s9, 256 }
 0x56b   : > { %p1854_p0 = scmp.lt.s32.totalorder %s2401_s16, %s1852_s9  ;;  %p1855_p4 = scmp.lt.s32.totalorder %s1853_s23, %s1847_s22 }
 0x56c   : > { %s2399_s26 = scalar_lea.hbm %s2494_s10, %s1458_s13  ;;  %p1850_p9 = pneg %p1849_p7 }
 0x56d   : > { %p1856_p2 = por %p1855_p4, %p1854_p0 }
 0x56f   : > { %p1857_p8 = pnand %p1856_p2, %p1850_p9 }
 0x62a   : > { %v1193_v4 = vpop.f32.mrb[20].mxu1 }
 0x62b   : > { %v1212_v5 = vadd.f32 %v1211_v3, %v1193_v4  ;;  %v1570_v6 = vpop.f32.mrb[21].mxu1 }
 0x62c   : > { %v1196_v7 = vpop.f32.mrb[22].mxu1 }
 0x62d   : > { %1213 = vst.msk [vmem:[%s2355_s24] sm:$0xff] %vm503_vm1, %v1212_v5  ;;  %v1571_v8 = vpop.f32.mrb[23].mxu1 }
 0x62e   : > { %1860 = shalt.err (!%p1857_p8)
}
 0x62f   : > { %s1861_s30 = scalar_lea.hbm %s2399_s26, 128  ;;  %s1865_s11 = scalar_lea.hbm %s2494_s10, 256 }
 0x630   : > { %p1862_p1 = scmp.ne.s32.totalorder %s2399_s26, %s1861_s30  ;;  %p1866_p11 = scmp.lt.u32.totalorder %s2399_s26, %s2494_s10 }
 0x631   : > { %p1867_p6 = scmp.lt.u32.totalorder %s1865_s11, %s1861_s30  ;;  %p1869_p5 = scmp.lt.u32.totalorder %s1861_s30, %s2399_s26 }
 0x632   : > { %p1863_p12 = pnand %p1862_p1, %p2175_p10 }
 0x633   : > { %p1868_p3 = por %p1867_p6, %p1866_p11 }
 0x634   : > { %p1864_p13 = pneg %p1863_p12 }
 0x635   : > { %p1870_p7 = por %p1869_p5, %p1868_p3 }
 0x637   : > { %p1871_p9 = pnand %p1870_p7, %p1864_p13 }
 0x639   : > { %1874 = shalt.err (!%p1871_p9)
}
 0x63a   : > { %1586 = dma.vmem_to_hbm [thread:$0]  (%p2175_p10), %s2401_s16, 128, %s2399_s26, %s1215_s21  }
 0x63b PF: > { %s2495_s27 = sld [smem:[#allocation18_spill]]  ;;  %s2496_s12 = sld [smem:[#allocation20_spill]] }
 0x63c   : > { %p2498_p4 = scmp.ge.s32.totalorder %s1941_s18, 2 }
 0x641   : > { %s1265_s22 = sand.u32 1, %s2495_s27   ;;  %p2497_p0 = scmp.ne.s32.totalorder %s2496_s12, 0 }
 0x642   : > { %s1266_s20 = scalar_lea.sflag [#allocation4], %s1265_s22 }
 0x643   : > { %p1605_p2 = pnand %p2498_p4, %p2497_p0 }
 0x645   : > { %1912 = dma.done.wait (!%p1605_p2), %s1266_s20, 128  }
 0x646   : > { %1914 = vsyncadd (!%p1605_p2), %s1266_s20, 4294967168  ;;  %s1275_s9 = scalar_lea.sflag [#allocation12], %s1265_s22 }
 0x647   : > { %1916 = dma.done.wait (!%p1605_p2), %s1275_s9, 512  }
 0x648   : > { %1918 = vsyncadd (!%p1605_p2), %s1275_s9, 4294966784  ;;  %s32_s18 = sadd.s32 1, %s1941_s18   ;;  %s2499_s13 = smov %s1925_s14 }
 0x649   : > { %p29_p8 = scmp.ge.s32.totalorder %s32_s18, 4   ;;  %s2500_s14 = smov %s1929_s15 }
 0x64a   : > { %s2501_s15 = smov %s2187_s19  ;;  %s2502_s16 = smov %s1937_s17 }
 0x64b   : > { %s2503_s17 = smov %s2505_s28  ;;  %31 = sbr.rel (!%p29_p8) target bundleno = 15 (0xf), region = 145 }
 0x652   :  { %1280 = vsyncpa [#allocation3], 1 }
 0x653   :  { %1282 = vsyncpa [#allocation3 + $0x1], 1 }
 0x654   :  { %1283 = vsyncpa [#allocation6], 1 }
 0x655   :  { %1284 = vsyncpa [#allocation9], 1 }
 0x656   :  { %1285 = vsyncpa [#allocation4], 1 }
 0x657   :  { %1287 = vsyncpa [#allocation4 + $0x1], 1 }
 0x658   :  { %1288 = vsyncpa [#allocation12], 1 }
 0x659   :  { %1290 = vsyncpa [#allocation12 + $0x1], 1 }

</bundles_post_ra>
